<compile_context>
chip_gen: v7x
topology: tpu7x:2x2x1
jax: 0.10.0
libtpu: 0.0.40
codegen_flags: <defaults>
</compile_context>

<pallas_src>
import functools

import jax
import jax.numpy as jnp
from jax.experimental import pallas as pl
from jax.experimental.pallas import tpu as pltpu

_LANE = 128
_SUBLANE = 8
_MAX_BLOCK_ROWS = 8192                 # hard cap on rows per tile
_INPUT_BYTES_BUDGET = 6 * 1024 * 1024  # per-step bytes across all 3 inputs (x2 when double-buffered)
_VMEM_LIMIT_BYTES = 48 * 1024 * 1024   # < v7x 64 MiB physical; > v5e 16 MiB scoped default


def _pow_static(p, gamma):
    """pred_score ** gamma with gamma static; avoid the exp/log power path when possible."""
    if gamma == 2.0:
        return p * p
    if gamma == 1.0:
        return p
    if gamma == 0.0:
        return jnp.ones_like(p)
    if float(gamma).is_integer() and 0.0 < gamma <= 8.0:
        out = p
        for _ in range(int(gamma) - 1):
            out = out * p
        return out
    return jnp.power(p, gamma)


def _vfl_terms(pred, gt, label, alpha, gamma, assume_binary_label):
    """Per-element loss terms, computed in f32.  Used both in-kernel and for the JAX tail."""
    p = pred.astype(jnp.float32)
    g = gt.astype(jnp.float32)
    lbl = label.astype(jnp.float32)

    p_pow = _pow_static(p, gamma)
    if assume_binary_label:
        # Optional micro-opt (only valid for one-hot {0,1} labels, as in PPYoloE):
        # one compare+select instead of two muls and an add.
        weight = jnp.where(lbl != 0.0, g, alpha * p_pow)
    else:
        weight = alpha * p_pow * (1.0 - lbl) + g * lbl

    # F.binary_cross_entropy(..., reduction='none') with PyTorch's log clamp at -100.
    log_p = jnp.maximum(jnp.log(p), -100.0)
    log_1mp = jnp.maximum(jnp.log(1.0 - p), -100.0)
    bce = -(g * log_p + (1.0 - g) * log_1mp)
    return bce * weight


def _vfl_kernel(pred_ref, gt_ref, label_ref, out_ref, *,
                alpha, gamma, rows_total, block_rows, assume_binary_label):
    i = pl.program_id(0)

    # The (8, 128) f32 output block is resident across the (single, "arbitrary") grid axis.
    @pl.when(i == 0)
    def _init():
        out_ref[...] = jnp.zeros_like(out_ref)

    contrib = _vfl_terms(pred_ref[...], gt_ref[...], label_ref[...],
                         alpha, gamma, assume_binary_label)

    def _accumulate(c):
        # Sublane-group vreg adds only (pure VPU, no per-step XLU / scalar RMW).
        partial = c.reshape(block_rows // _SUBLANE, _SUBLANE, _LANE).sum(axis=0)
        out_ref[...] += partial

    if rows_total % block_rows == 0:
        # All blocks are full: no masking code generated at all.
        _accumulate(contrib)
    else:
        # Only the last block is ragged.  Keep the mask a SELECT (jnp.where): the
        # unspecified out-of-bounds rows may contain garbage whose log/pow is
        # NaN/Inf, and a multiply-by-0 mask would propagate it into the sum.
        is_last = i == pl.num_programs(0) - 1

        @pl.when(jnp.logical_not(is_last))
        def _bulk():
            _accumulate(contrib)

        @pl.when(is_last)
        def _ragged():
            row_idx = i * block_rows + jax.lax.broadcasted_iota(
                jnp.int32, (block_rows, _LANE), 0)
            _accumulate(jnp.where(row_idx < rows_total, contrib, 0.0))


def varifocal_loss(pred_score, gt_score, label, alpha=0.75, gamma=2.0,
                   assume_binary_label=False):
    """Scalar varifocal loss; matches VarifocalLoss.forward (default flags)."""
    out_dtype = pred_score.dtype
    n = pred_score.size

    # Contiguous flatten: free in XLA (no data movement).
    p_flat = pred_score.reshape(-1)
    g_flat = gt_score.reshape(-1)
    l_flat = label.reshape(-1)

    n_aligned = (n // _LANE) * _LANE
    tail = n - n_aligned

    total = jnp.zeros((), jnp.float32)

    if tail:
        # O(<128) fixup in plain JAX — avoids jnp.pad'ing (i.e. fully copying)
        # all three inputs in HBM when the size isn't a multiple of 128.
        total = total + jnp.sum(
            _vfl_terms(p_flat[n_aligned:], g_flat[n_aligned:], l_flat[n_aligned:],
                       alpha, gamma, assume_binary_label))

    if n_aligned:
        if tail:
            p2 = p_flat[:n_aligned].reshape(-1, _LANE)
            g2 = g_flat[:n_aligned].reshape(-1, _LANE)
            l2 = l_flat[:n_aligned].reshape(-1, _LANE)
        else:
            p2 = p_flat.reshape(-1, _LANE)
            g2 = g_flat.reshape(-1, _LANE)
            l2 = l_flat.reshape(-1, _LANE)

        rows = n_aligned // _LANE
        itemsizes = [x.dtype.itemsize for x in (p2, g2, l2)]

        # Row alignment follows the sublane packing of the widest requirement:
        # f32 -> 8 rows/vreg, bf16 -> 16, int8/fp8 -> 32.
        row_align = max(_SUBLANE * max(1, 4 // s) for s in itemsizes)

        # Largest tile within the per-step input-byte budget, aligned, capped.
        bytes_per_row = _LANE * sum(itemsizes)
        budget_rows = max(row_align, _INPUT_BYTES_BUDGET // bytes_per_row)
        budget_rows = max(row_align, (budget_rows // row_align) * row_align)
        rows_padded = -(-rows // row_align) * row_align
        block_rows = min(rows_padded, budget_rows, _MAX_BLOCK_ROWS)

        num_blocks = -(-rows // block_rows)  # ceil

        kernel = functools.partial(
            _vfl_kernel,
            alpha=float(alpha), gamma=float(gamma),
            rows_total=rows, block_rows=block_rows,
            assume_binary_label=bool(assume_binary_label))

        in_specs = [pl.BlockSpec((block_rows, _LANE), lambda i: (i, 0))
                    for _ in range(3)]

        partials = pl.pallas_call(
            kernel,
            out_shape=jax.ShapeDtypeStruct((_SUBLANE, _LANE), jnp.float32),
            grid_spec=pltpu.PrefetchScalarGridSpec(
                num_scalar_prefetch=0,
                grid=(num_blocks,),
                in_specs=in_specs,
                out_specs=pl.BlockSpec((_SUBLANE, _LANE), lambda i: (0, 0)),
            ),
            compiler_params=pltpu.CompilerParams(
                dimension_semantics=("arbitrary",),
                vmem_limit_bytes=_VMEM_LIMIT_BYTES,
            ),
        )(p2, g2, l2)

        # Single tiny cross-lane reduce (8*128 f32) outside the kernel.
        total = total + jnp.sum(partials)

    return total.astype(out_dtype)


def _reference_loss(pred_score, gt_score, label, alpha=0.75, gamma=2.0):
    p = pred_score.astype(jnp.float32)
    g = gt_score.astype(jnp.float32)
    lbl = label.astype(jnp.float32)
    weight = alpha * jnp.power(p, gamma) * (1.0 - lbl) + g * lbl
    log_p = jnp.maximum(jnp.log(p), -100.0)
    log_1mp = jnp.maximum(jnp.log(1.0 - p), -100.0)
    bce = -(g * log_p + (1.0 - g) * log_1mp)
    return jnp.sum(bce * weight)


if __name__ == "__main__":
    key = jax.random.PRNGKey(0)

    # Typical PPYoloE usage: pred_score/gt_score/label are (batch, anchors, classes).
    B, N, C = 2, 8, 80
    k1, k2, k3 = jax.random.split(key, 3)
    pred_score = jax.nn.sigmoid(jax.random.normal(k1, (B, N, C), jnp.float32))
    label = (jax.random.uniform(k2, (B, N, C)) > 0.9).astype(jnp.float32)
    gt_score = jax.random.uniform(k3, (B, N, C), jnp.float32) * label

    loss = jax.block_until_ready(varifocal_loss(pred_score, gt_score, label))
    ref = jax.block_until_ready(_reference_loss(pred_score, gt_score, label))
    assert jnp.allclose(loss, ref, rtol=1e-5, atol=1e-3), (loss, ref)

    # Awkward shape: exercises the lane-unaligned JAX-tail path + ragged-row mask.
    k4, k5, k6 = jax.random.split(jax.random.PRNGKey(1), 3)
    p_b = jax.nn.sigmoid(jax.random.normal(k4, (3, 7, 11), jnp.float32))
    l_b = (jax.random.uniform(k5, (3, 7, 11)) > 0.8).astype(jnp.float32)
    g_b = jax.random.uniform(k6, (3, 7, 11), jnp.float32) * l_b

    loss_b = jax.block_until_ready(varifocal_loss(p_b, g_b, l_b))
    ref_b = jax.block_until_ready(_reference_loss(p_b, g_b, l_b))
    assert jnp.allclose(loss_b, ref_b, rtol=1e-5, atol=1e-3), (loss_b, ref_b)

    # bf16 inputs: exercises original-dtype DMA + 16-row sublane-packing alignment.
    p_c = pred_score.astype(jnp.bfloat16)
    g_c = gt_score.astype(jnp.bfloat16)
    l_c = label.astype(jnp.bfloat16)
    loss_c = jax.block_until_ready(varifocal_loss(p_c, g_c, l_c))
    ref_c = jax.block_until_ready(_reference_loss(p_c, g_c, l_c))
    assert jnp.allclose(jnp.float32(loss_c), ref_c, rtol=2e-2, atol=1e-1), (loss_c, ref_c)

    print("KERNEL_OK")
</pallas_src>

<mosaic_0001>
module attributes {stable_mosaic.version = 11 : i64} {
  func.func @_vfl_kernel(%arg0: i32, %arg1: memref<16x128xf32, #tpu.memory_space<vmem>>, %arg2: memref<16x128xf32, #tpu.memory_space<vmem>>, %arg3: memref<16x128xf32, #tpu.memory_space<vmem>>, %arg4: memref<8x128xf32, #tpu.memory_space<vmem>>) attributes {dimension_semantics = [#tpu.dimension_semantics<arbitrary>], iteration_bounds = array<i64: 1>, scalar_prefetch = 0 : i64, scratch_operands = 0 : i64, tpu.core_type = #tpu.core_type<tc>, window_params = [{transform_indices = @transform_0, window_bounds = array<i64: 16, 128>}, {transform_indices = @transform_1, window_bounds = array<i64: 16, 128>}, {transform_indices = @transform_2, window_bounds = array<i64: 16, 128>}, {pipeline_mode = #tpu.pipeline_mode<synchronous>, transform_indices = @transform_3, window_bounds = array<i64: 8, 128>}]} {
    %c0_i32 = arith.constant 0 : i32
    %0 = arith.cmpi eq, %arg0, %c0_i32 : i32
    %1 = arith.extui %0 : i1 to i32
    %c0_i32_0 = arith.constant 0 : i32
    %2 = arith.cmpi ne, %1, %c0_i32_0 : i32
    scf.if %2 {
      %cst_15 = arith.constant 0.000000e+00 : f32
      %36 = vector.broadcast %cst_15 : f32 to vector<8x128xf32>
      %c0_16 = arith.constant 0 : index
      %c0_17 = arith.constant 0 : index
      %37 = vector.load %arg4[%c0_16, %c0_17] : memref<8x128xf32, #tpu.memory_space<vmem>>, vector<8x128xf32>
      tpu.vector_store %arg4[%c0_16, %c0_17], %36 {strides = array<i32>} : memref<8x128xf32, #tpu.memory_space<vmem>>, vector<8x128xf32>,
    } else {
    }
    %c0 = arith.constant 0 : index
    %c0_1 = arith.constant 0 : index
    %3 = vector.load %arg1[%c0, %c0_1] : memref<16x128xf32, #tpu.memory_space<vmem>>, vector<16x128xf32>
    %c0_2 = arith.constant 0 : index
    %c0_3 = arith.constant 0 : index
    %4 = vector.load %arg2[%c0_2, %c0_3] : memref<16x128xf32, #tpu.memory_space<vmem>>, vector<16x128xf32>
    %c0_4 = arith.constant 0 : index
    %c0_5 = arith.constant 0 : index
    %5 = vector.load %arg3[%c0_4, %c0_5] : memref<16x128xf32, #tpu.memory_space<vmem>>, vector<16x128xf32>
    %6 = arith.mulf %3, %3 : vector<16x128xf32>
    %cst = arith.constant 7.500000e-01 : f32
    %7 = vector.broadcast %cst : f32 to vector<16x128xf32>
    %8 = arith.mulf %7, %6 : vector<16x128xf32>
    %cst_6 = arith.constant 1.000000e+00 : f32
    %9 = vector.broadcast %cst_6 : f32 to vector<16x128xf32>
    %10 = arith.subf %9, %5 : vector<16x128xf32>
    %11 = arith.mulf %8, %10 : vector<16x128xf32>
    %12 = arith.mulf %4, %5 : vector<16x128xf32>
    %13 = arith.addf %11, %12 : vector<16x128xf32>
    %14 = math.log %3 : vector<16x128xf32>
    %cst_7 = arith.constant -1.000000e+02 : f32
    %15 = vector.broadcast %cst_7 : f32 to vector<16x128xf32>
    %16 = arith.maximumf %14, %15 : vector<16x128xf32>
    %cst_8 = arith.constant 1.000000e+00 : f32
    %17 = vector.broadcast %cst_8 : f32 to vector<16x128xf32>
    %18 = arith.subf %17, %3 : vector<16x128xf32>
    %19 = math.log %18 : vector<16x128xf32>
    %cst_9 = arith.constant -1.000000e+02 : f32
    %20 = vector.broadcast %cst_9 : f32 to vector<16x128xf32>
    %21 = arith.maximumf %19, %20 : vector<16x128xf32>
    %22 = arith.mulf %4, %16 : vector<16x128xf32>
    %cst_10 = arith.constant 1.000000e+00 : f32
    %23 = vector.broadcast %cst_10 : f32 to vector<16x128xf32>
    %24 = arith.subf %23, %4 : vector<16x128xf32>
    %25 = arith.mulf %24, %21 : vector<16x128xf32>
    %26 = arith.addf %22, %25 : vector<16x128xf32>
    %cst_11 = arith.constant 0.000000e+00 : f32
    %27 = vector.broadcast %cst_11 : f32 to vector<16x128xf32>
    %28 = arith.subf %27, %26 : vector<16x128xf32>
    %29 = arith.mulf %28, %13 : vector<16x128xf32>
    %c0_i32_12 = arith.constant 0 : i32
    %30 = arith.cmpi eq, %arg0, %c0_i32_12 : i32
    %true = arith.constant true
    %31 = arith.xori %30, %true : i1
    %32 = arith.extui %31 : i1 to i32
    %c0_i32_13 = arith.constant 0 : i32
    %33 = arith.cmpi ne, %32, %c0_i32_13 : i32
    scf.if %33 {
      %36 = vector.shape_cast %29 : vector<16x128xf32> to vector<2x8x128xf32>
      %cst_15 = arith.constant dense<0.000000e+00> : vector<8x128xf32>
      %37 = vector.multi_reduction <add>, %36, %cst_15 [0] : vector<2x8x128xf32> to vector<8x128xf32>
      %c0_16 = arith.constant 0 : index
      %c0_17 = arith.constant 0 : index
      %38 = vector.load %arg4[%c0_16, %c0_17] : memref<8x128xf32, #tpu.memory_space<vmem>>, vector<8x128xf32>
      %39 = arith.addf %38, %37 : vector<8x128xf32>
      %c0_18 = arith.constant 0 : index
      %c0_19 = arith.constant 0 : index
      %40 = vector.load %arg4[%c0_18, %c0_19] : memref<8x128xf32, #tpu.memory_space<vmem>>, vector<8x128xf32>
      tpu.vector_store %arg4[%c0_18, %c0_19], %39 {strides = array<i32>} : memref<8x128xf32, #tpu.memory_space<vmem>>, vector<8x128xf32>,
    } else {
    }
    %34 = arith.extui %30 : i1 to i32
    %c0_i32_14 = arith.constant 0 : i32
    %35 = arith.cmpi ne, %34, %c0_i32_14 : i32
    scf.if %35 {
      %c16_i32 = arith.constant 16 : i32
      %36 = arith.muli %arg0, %c16_i32 : i32
      %37 = tpu.iota {dimensions = array<i32: 0>} : vector<16x128xi32>
      %38 = vector.broadcast %36 : i32 to vector<16x128xi32>
      %39 = arith.addi %38, %37 : vector<16x128xi32>
      %c10_i32 = arith.constant 10 : i32
      %40 = vector.broadcast %c10_i32 : i32 to vector<16x128xi32>
      %41 = arith.cmpi slt, %39, %40 : vector<16x128xi32>
      %cst_15 = arith.constant 0.000000e+00 : f32
      %42 = vector.broadcast %cst_15 : f32 to vector<16x128xf32>
      %43 = arith.select %41, %29, %42 : vector<16x128xi1>, vector<16x128xf32>
      %44 = vector.shape_cast %43 : vector<16x128xf32> to vector<2x8x128xf32>
      %cst_16 = arith.constant dense<0.000000e+00> : vector<8x128xf32>
      %45 = vector.multi_reduction <add>, %44, %cst_16 [0] : vector<2x8x128xf32> to vector<8x128xf32>
      %c0_17 = arith.constant 0 : index
      %c0_18 = arith.constant 0 : index
      %46 = vector.load %arg4[%c0_17, %c0_18] : memref<8x128xf32, #tpu.memory_space<vmem>>, vector<8x128xf32>
      %47 = arith.addf %46, %45 : vector<8x128xf32>
      %c0_19 = arith.constant 0 : index
      %c0_20 = arith.constant 0 : index
      %48 = vector.load %arg4[%c0_19, %c0_20] : memref<8x128xf32, #tpu.memory_space<vmem>>, vector<8x128xf32>
      tpu.vector_store %arg4[%c0_19, %c0_20], %47 {strides = array<i32>} : memref<8x128xf32, #tpu.memory_space<vmem>>, vector<8x128xf32>,
    } else {
    }
    return
  }
  func.func @transform_0(%arg0: i32) -> (i32, i32) {
    %c0_i32 = arith.constant 0 : i32
    %c0_i32_0 = arith.constant 0 : i32
    return %arg0, %c0_i32 : i32, i32
  }
  func.func @transform_1(%arg0: i32) -> (i32, i32) {
    %c0_i32 = arith.constant 0 : i32
    %c0_i32_0 = arith.constant 0 : i32
    return %arg0, %c0_i32 : i32, i32
  }
  func.func @transform_2(%arg0: i32) -> (i32, i32) {
    %c0_i32 = arith.constant 0 : i32
    %c0_i32_0 = arith.constant 0 : i32
    return %arg0, %c0_i32 : i32, i32
  }
  func.func @transform_3(%arg0: i32) -> (i32, i32) {
    %c0_i32 = arith.constant 0 : i32
    %c0_i32_0 = arith.constant 0 : i32
    %c0_i32_1 = arith.constant 0 : i32
    return %c0_i32, %c0_i32_0 : i32, i32
  }
}

</mosaic_0001>

<bundles_post_ra>
// kernel: tpu_custom_call.1
= control target key start
LH: loop header
LB: loop body
LE: loop exit
PB: predicated region body
PF: predicated region fallthrough
CT: control target
= control target key end

     0   :  { %8 = vsyncpa [#allocation3], 0  ;;  %s346_s0 = inlined_call_operand.hbm [shape: f32[10,128], index: 0, kind: input, shape index: {}]   ;;  %s347_s1 = inlined_call_operand.hbm [shape: f32[10,128], index: 1, kind: input, shape index: {}]   ;;  %s348_s2 = inlined_call_operand.hbm [shape: f32[10,128], index: 2, kind: input, shape index: {}]   ;;  %s349_s3 = inlined_call_operand.hbm [shape: f32[8,128], index: 3, kind: output, shape index: {}]  }
   0x1   :  { %9 = vsyncpa [#allocation6], 0 }
   0x2   :  { %10 = vsyncpa [#allocation4], 0  ;;  %s256_s12 = smov [#allocation5]   ;;  %s257_s14 = smov [#allocation2]  }
   0x3   :  { %s28_s13 = sshll.u32 %s256_s12, 4  ;;  %s16_s15 = sshll.u32 %s257_s14, 4  ;;  %s29_s13 = int_to_ptr.vmem [resolvable:$true] %s28_s13  ;;  %s282_s15 = int_to_ptr.vmem [resolvable:$true] %s16_s15 }
   0x4   :  { %s162_s18 = scalar_lea.hbm %s347_s1, 256 }
   0x5   :  { %p163_p0 = scmp.ne.s32.totalorder %s347_s1, %s162_s18  ;;  %p166_p1 = scmp.lt.u32.totalorder %s162_s18, %s347_s1 }
   0x7   :  { %p168_p2 = pnand %p166_p1, %p163_p0 }
   0x9   :  { %171 = shalt.err (!%p168_p2)
}
   0xa   :  { %s172_s23 = scalar_lea.vmem %s29_s13, 256  ;;  %p177_p4 = scmp.lt.s32.totalorder %s29_s13, %s29_s13 }
   0xb   :  { %p173_p3 = scmp.ne.s32.totalorder %s29_s13, %s172_s23  ;;  %p178_p5 = scmp.lt.s32.totalorder %s172_s23, %s172_s23 }
   0xd   :  { %p179_p6 = por %p178_p5, %p177_p4 }
   0xf   :  { %p180_p7 = pnand %p179_p6, %p173_p3 }
  0x11   :  { %183 = shalt.err (!%p180_p7)
}
  0x12   :  { %s258_s24 = smov 128   ;;  %s259_s25 = smov 8  }
  0x13   :  { %34 = dma.hbm_to_vmem [thread:$0]  %s347_s1, 256, %s29_s13, [#allocation6], %s258_s24, %s258_s24, %s259_s25  }
  0x14   :  { %s184_s30 = scalar_lea.hbm %s346_s0, 256 }
  0x15   :  { %p185_p8 = scmp.ne.s32.totalorder %s346_s0, %s184_s30  ;;  %p188_p9 = scmp.lt.u32.totalorder %s184_s30, %s346_s0 }
  0x17   :  { %p190_p10 = pnand %p188_p9, %p185_p8 }
  0x19   :  { %193 = shalt.err (!%p190_p10)
}
  0x1a   :  { %s194_s8 = scalar_lea.vmem %s282_s15, 256  ;;  %p199_p12 = scmp.lt.s32.totalorder %s282_s15, %s282_s15 }
  0x1b   :  { %p195_p11 = scmp.ne.s32.totalorder %s282_s15, %s194_s8  ;;  %p200_p13 = scmp.lt.s32.totalorder %s194_s8, %s194_s8 }
  0x1d   :  { %p201_p0 = por %p200_p13, %p199_p12 }
  0x1f   :  { %p202_p1 = pnand %p201_p0, %p195_p11 }
  0x21   :  { %205 = shalt.err (!%p202_p1)
}
  0x22   :  { %22 = dma.hbm_to_vmem [thread:$0]  %s346_s0, 256, %s282_s15, [#allocation3], %s258_s24, %s258_s24, %s259_s25  }
  0x23   :  { %s260_s10 = smov [#allocation7]   ;;  %s206_s14 = scalar_lea.hbm %s348_s2, 256 }
  0x24   :  { %s40_s11 = sshll.u32 %s260_s10, 4  ;;  %p207_p2 = scmp.ne.s32.totalorder %s348_s2, %s206_s14  ;;  %s41_s11 = int_to_ptr.vmem [resolvable:$true] %s40_s11 }
  0x25   :  { %p210_p3 = scmp.lt.u32.totalorder %s206_s14, %s348_s2 }
  0x27   :  { %p212_p4 = pnand %p210_p3, %p207_p2 }
  0x29   :  { %215 = shalt.err (!%p212_p4)
}
  0x2a   :  { %s216_s20 = scalar_lea.vmem %s41_s11, 256  ;;  %p221_p6 = scmp.lt.s32.totalorder %s41_s11, %s41_s11 }
  0x2b   :  { %p217_p5 = scmp.ne.s32.totalorder %s41_s11, %s216_s20  ;;  %p222_p7 = scmp.lt.s32.totalorder %s216_s20, %s216_s20 }
  0x2d   :  { %p223_p8 = por %p222_p7, %p221_p6 }
  0x2f   :  { %p224_p9 = pnand %p223_p8, %p217_p5 }
  0x31   :  { %227 = shalt.err (!%p224_p9)
}
  0x32   :  { %46 = dma.hbm_to_vmem [thread:$0]  %s348_s2, 256, %s41_s11, [#allocation6], %s258_s24, %s258_s24, %s259_s25  }
  0x33   :  { %250 = dma.done.wait [#allocation3], 256  }
  0x34   :  { %251 = vsyncadd [#allocation3], 4294967040 }
  0x35   :  { %252 = dma.done.wait [#allocation6], 512  }
  0x36   :  { %253 = vsyncadd [#allocation6], 4294966784  ;;  %v61_v0 = vld [vmem:[#allocation2] sm:$0xff]  ;;  %v62_v1 = vld [vmem:[#allocation2 + $0x8] sm:$0xff]  ;;  %v117_v11 = vlaneseq  ;;  %s261_s2 = smov [#allocation8]  }
  0x37   :  { %154 = vlog2.f32 %v61_v0  ;;  %v85_v2 = vsub.f32 1.0, %v61_v0  ;;  %v86_v3 = vsub.f32 1.0, %v62_v1  ;;  %v67_v4 = vmul.f32 %v61_v0, %v61_v0  ;;  %v65_v5 = vld [vmem:[#allocation7] sm:$0xff]  ;;  %v66_v8 = vld [vmem:[#allocation7 + $0x8] sm:$0xff]  ;;  %v63_v9 = vld [vmem:[#allocation5] sm:$0xff]  ;;  %s137_s21 = sshll.u32 %s261_s2, 4  ;;  %s138_s21 = int_to_ptr.vmem [resolvable:$true] %s137_s21 }
  0x38   :  { %156 = vlog2.f32 %v62_v1  ;;  %v68_v6 = vmul.f32 %v62_v1, %v62_v1  ;;  %v64_v13 = vld [vmem:[#allocation5 + $0x8] sm:$0xff]  ;;  %v71_v15 = vsub.f32 1.0, %v65_v5  ;;  %v72_v18 = vsub.f32 1.0, %v66_v8  ;;  %s228_s22 = scalar_lea.vmem %s138_s21, 128  ;;  %p233_p11 = scmp.lt.s32.totalorder %s138_s21, %s138_s21 }
  0x39   :  { %158 = vlog2.f32 %v85_v2  ;;  %v69_v14 = vmul.f32 0.75, %v67_v4  ;;  %v95_v23 = vsub.f32 1.0, %v63_v9  ;;  %v96_v26 = vsub.f32 1.0, %v64_v13  ;;  %p229_p10 = scmp.ne.s32.totalorder %s138_s21, %s228_s22  ;;  %p234_p12 = scmp.lt.s32.totalorder %s228_s22, %s228_s22 }
  0x3a   :  { %160 = vlog2.f32 %v86_v3  ;;  %v70_v17 = vmul.f32 0.75, %v68_v6  ;;  %v118_v27 = vshrl.u32 %v117_v11, 7  ;;  %v75_v29 = vmul.f32 %v65_v5, %v63_v9 }
  0x3b   :  { %v73_v28 = vmul.f32 %v71_v15, %v69_v14  ;;  %v76_v33 = vmul.f32 %v66_v8, %v64_v13  ;;  %p235_p13 = por %p234_p12, %p233_p11 }
  0x3c   :  { %v74_v32 = vmul.f32 %v72_v18, %v70_v17  ;;  %v119_v40 = vadd.s32 8, %v118_v27 }
  0x3d   :  { %v77_v38 = vadd.f32 %v75_v29, %v73_v28  ;;  %p236_p0 = pnand %p235_p13, %p229_p10 }
  0x3e   :  { %v78_v41 = vadd.f32 %v76_v33, %v74_v32  ;;  %vm124_vm0 = vcmp.lt.s32.totalorder %v119_v40, 10 }
  0x41   :  { %v155_v7 = vpop.eup %154 }
  0x42   :  { %v80_v10 = vmul.f32 0.6931472, %v155_v7  ;;  %v157_v12 = vpop.eup %156 }
  0x43   :  { %v159_v16 = vpop.eup %158  ;;  %v82_v19 = vmul.f32 0.6931472, %v157_v12 }
  0x44   :  { %v83_v20 = vmax.f32 %v80_v10, -100.0  ;;  %v161_v21 = vpop.eup %160  ;;  %v88_v22 = vmul.f32 0.6931472, %v159_v16 }
  0x45   :  { %v84_v24 = vmax.f32 %v82_v19, -100.0  ;;  %v90_v25 = vmul.f32 0.6931472, %v161_v21 }
  0x46   :  { %v91_v30 = vmax.f32 %v88_v22, -100.0  ;;  %v93_v31 = vmul.f32 %v83_v20, %v63_v9 }
  0x47   :  { %v92_v34 = vmax.f32 %v90_v25, -100.0  ;;  %v94_v35 = vmul.f32 %v84_v24, %v64_v13 }
  0x48   :  { %v97_v36 = vmul.f32 %v95_v23, %v91_v30 }
  0x49   :  { %v98_v37 = vmul.f32 %v96_v26, %v92_v34 }
  0x4a   :  { %v99_v39 = vadd.f32 %v97_v36, %v93_v31 }
  0x4b   :  { %v100_v42 = vadd.f32 %v98_v37, %v94_v35 }
  0x4c   :  { %v101_v43 = vsub.f32 0.0, %v99_v39 }
  0x4d   :  { %v102_v44 = vsub.f32 0.0, %v100_v42 }
  0x4e   :  { %v103_v45 = vmul.f32 %v101_v43, %v77_v38 }
  0x4f   :  { %v104_v46 = vmul.f32 %v102_v44, %v78_v41 }
  0x51   :  { %v126_v47 = vsel %vm124_vm0, %v104_v46, 0.0 }
  0x52   :  { %v127_v48 = vadd.f32 %v126_v47, %v103_v45 }
  0x54   :  { %130 = vst [vmem:[#allocation8] sm:$0xff] %v127_v48 }
  0x55   :  { %239 = shalt.err (!%p236_p0)
}
  0x56   :  { %s240_s25 = scalar_lea.hbm %s349_s3, 128 }
  0x57   :  { %p241_p1 = scmp.ne.s32.totalorder %s349_s3, %s240_s25  ;;  %p244_p2 = scmp.lt.u32.totalorder %s240_s25, %s349_s3 }
  0x59   :  { %p246_p3 = pnand %p244_p2, %p241_p1 }
  0x5b   :  { %249 = shalt.err (!%p246_p3)
}
  0x5c   :  { %140 = dma.vmem_to_hbm [thread:$0]  %s138_s21, 128, %s349_s3, [#allocation4]  }
  0x5d   :  { %254 = dma.done.wait [#allocation4], 128  }
  0x5e   :  { %255 = vsyncadd [#allocation4], 4294967168 }
  0x5f   :  { %144 = vsyncpa [#allocation3], 1 }
  0x60   :  { %145 = vsyncpa [#allocation6], 1 }
  0x61   :  { %146 = vsyncpa [#allocation4], 1 }

</bundles_post_ra>
